<compile_context>
chip_gen: v5e
topology: v5e:2x2
jax: 0.10.0
libtpu: 0.0.40
codegen_flags: <defaults>
</compile_context>

<pallas_src>
import functools

import jax
import jax.numpy as jnp
from jax.experimental import pallas as pl
from jax.experimental.pallas import tpu as pltpu

EPS = 1e-5


def _round_up(x, m):
    return ((x + m - 1) // m) * m


def _device_kind():
    try:
        return jax.devices()[0].device_kind.lower()
    except Exception:
        return ""


def _is_v7x():
    return "7" in _device_kind()


def _has_second_tensorcore():
    kind = _device_kind()
    return any(tag in kind for tag in ("7", "v4", "v5p"))


def _conv_stats_kernel(x_cur_ref, x_nxt_ref, w_ref, gamma_ref, beta_ref,
                       conv_ref, scale_ref, shift_ref,
                       col_ref, sum_ref, ssq_ref,
                       *, k_size, ci, tt, t_out, inv_n, mask_last):
    """grid = (co_tile [parallel], batch, time_tile).

    x_cur_ref : [1, Ci, TT]   current time tile of x
    x_nxt_ref : [1, Ci, 128]  head of the next tile (conv halo; block index clamped)
    w_ref     : [CO_T, Ci*K]  fused im2col weights  (W2[co, k*Ci + c] = w[co, c, k])
    gamma_ref, beta_ref : [CO_T, 1]
    conv_ref  : [1, CO_T, TT] un-normalized conv tile (lane-dense [Co, time])
    scale_ref, shift_ref : [CO_T, 1]  folded BN affine (written once at the last step)
    col_ref   : VMEM [Ci*K, TT]  im2col scratch
    sum_ref, ssq_ref : VMEM [CO_T, 1]  batch-stat accumulators (persist across steps)
    """
    b = pl.program_id(1)
    m = pl.program_id(2)
    nb = pl.num_programs(1)
    nm = pl.num_programs(2)

    # ---- im2col assembly: col[k*Ci + c, j] = x[c, m*TT + j + k] ----
    xc = x_cur_ref[0]                                   # [Ci, TT]
    col_ref[0:ci, :] = xc                               # tap 0 (full width, aligned)
    if k_size > 1:
        xn = x_nxt_ref[0]                               # [Ci, 128] halo
        for k in range(1, k_size):                      # static, small K
            col_ref[k * ci:(k + 1) * ci, 0:tt - k] = xc[:, k:]
            col_ref[k * ci:(k + 1) * ci, tt - k:tt] = xn[:, 0:k]

    # ---- conv: ONE fused MXU matmul, contraction over Ci*K ----
    conv = jnp.dot(w_ref[...], col_ref[...], preferred_element_type=jnp.float32)
    conv_ref[0] = conv.astype(conv_ref.dtype)           # written once; reloaded by pass 2

    # ---- batch statistics (one-pass sum / sum-of-squares) ----
    @pl.when(jnp.logical_and(b == 0, m == 0))
    def _init():
        sum_ref[...] = jnp.zeros_like(sum_ref)
        ssq_ref[...] = jnp.zeros_like(ssq_ref)

    def _acc(v):
        sum_ref[...] += jnp.sum(v, axis=-1, keepdims=True)
        ssq_ref[...] += jnp.sum(v * v, axis=-1, keepdims=True)

    if mask_last:
        # Only the last time tile carries padded columns; interior tiles skip the mask.
        @pl.when(m < nm - 1)
        def _acc_interior():
            _acc(conv)

        @pl.when(m == nm - 1)
        def _acc_last():
            colid = jax.lax.broadcasted_iota(jnp.int32, (1, tt), 1) + m * tt
            _acc(jnp.where(colid < t_out, conv, 0.0))
    else:
        _acc(conv)

    # ---- fold batch stats + gamma/beta into per-channel scale/shift ----
    @pl.when(jnp.logical_and(b == nb - 1, m == nm - 1))
    def _finalize():
        mean = sum_ref[...] * inv_n
        var = ssq_ref[...] * inv_n - mean * mean        # biased batch variance
        s = gamma_ref[...] * jax.lax.rsqrt(var + EPS)
        scale_ref[...] = s
        shift_ref[...] = beta_ref[...] - mean * s


def _bn_relu_kernel(conv_ref, scale_ref, shift_ref, o_ref):
    """Cheap VPU pass: y = relu(conv * scale + shift).  conv HBM buffer is aliased to o."""
    y = conv_ref[0] * scale_ref[...] + shift_ref[...]
    o_ref[0] = jnp.maximum(y, 0.0).astype(o_ref.dtype)


@functools.partial(jax.jit, static_argnames=("kernel_size", "time_tile"))
def conv1d_bn_relu(x, weight, gamma, beta, *, kernel_size=5, time_tile=None):
    """x: [B, Ci, T] f32; weight: [Co, Ci, K]; gamma/beta: [Co]. Returns [B, Co, T-K+1]."""
    B, Ci, T = x.shape
    Co = weight.shape[0]
    K = kernel_size
    assert weight.shape == (Co, Ci, K), weight.shape
    assert T >= K, "input too short for the conv kernel"
    assert 1 <= K <= 128, "kernel_size must be <= 128"
    T_out = T - K + 1

    # --- Co tiling: give the second TensorCore (v7x / v4 / v5p) a parallel axis. ---
    if Co % 256 == 0:
        co_t = 128
    elif Co >= 16 and Co % 16 == 0 and _has_second_tensorcore():
        co_t = Co // 2                      # multiple of 8 by construction
    else:
        co_t = Co
    n_co = Co // co_t

    # --- time tiling (lane axis): big tiles, auto-shrunk to a VMEM budget. ---
    v7x = _is_v7x()
    if time_tile is None:
        time_tile = 1024 if v7x else 2048   # v7x: 64 MiB VMEM/TC; v5e/v6e: 128 MiB
    vmem_limit = (48 if v7x else 64) * 1024 * 1024
    tt = min(_round_up(time_tile, 128), _round_up(T_out, 128))

    def _footprint(t):   # rough per-step VMEM bytes (double-buffered IO + scratch)
        return 4 * (2 * Ci * t + 2 * Ci * 128        # x tile + halo (x2 buffers)
                    + Ci * K * t                     # im2col scratch
                    + 2 * co_t * t                   # conv output tile (x2 buffers)
                    + 2 * co_t * Ci * K + 8 * co_t)  # weights + affine params
    while tt > 128 and _footprint(tt) > vmem_limit - 8 * 1024 * 1024:
        tt -= 128

    mt = pl.cdiv(T_out, tt)
    tt_sub = tt // 128
    nxt_max = pl.cdiv(T, 128) - 1   # clamp for the halo block -> DMA never out of bounds

    x32 = x.astype(jnp.float32)
    # fused im2col weight layout: W2[co, k*Ci + c] = weight[co, c, k]
    w2 = jnp.transpose(weight.astype(jnp.float32), (0, 2, 1)).reshape(Co, K * Ci)
    gamma2 = gamma.reshape(Co, 1).astype(jnp.float32)
    beta2 = beta.reshape(Co, 1).astype(jnp.float32)

    kernel1 = functools.partial(
        _conv_stats_kernel, k_size=K, ci=Ci, tt=tt, t_out=T_out,
        inv_n=1.0 / float(B * T_out), mask_last=(mt * tt > T_out))

    # ---- Pass 1: conv (computed once) + batch stats -> folded scale/shift ----
    conv, scale, shift = pl.pallas_call(
        kernel1,
        out_shape=(
            jax.ShapeDtypeStruct((B, Co, T_out), jnp.float32),
            jax.ShapeDtypeStruct((Co, 1), jnp.float32),
            jax.ShapeDtypeStruct((Co, 1), jnp.float32),
        ),
        grid=(n_co, B, mt),
        in_specs=[
            pl.BlockSpec((1, Ci, tt), lambda c, b, m: (b, 0, m)),
            pl.BlockSpec((1, Ci, 128),
                         lambda c, b, m: (b, 0, jnp.minimum((m + 1) * tt_sub, nxt_max))),
            pl.BlockSpec((co_t, Ci * K), lambda c, b, m: (c, 0)),
            pl.BlockSpec((co_t, 1), lambda c, b, m: (c, 0)),
            pl.BlockSpec((co_t, 1), lambda c, b, m: (c, 0)),
        ],
        out_specs=(
            pl.BlockSpec((1, co_t, tt), lambda c, b, m: (b, c, m)),
            pl.BlockSpec((co_t, 1), lambda c, b, m: (c, 0)),
            pl.BlockSpec((co_t, 1), lambda c, b, m: (c, 0)),
        ),
        scratch_shapes=[
            pltpu.VMEM((Ci * K, tt), jnp.float32),   # im2col block
            pltpu.VMEM((co_t, 1), jnp.float32),      # sum(conv)
            pltpu.VMEM((co_t, 1), jnp.float32),      # sum(conv^2)
        ],
        compiler_params=pltpu.CompilerParams(
            dimension_semantics=("parallel", "arbitrary", "arbitrary"),
            vmem_limit_bytes=vmem_limit),
    )(x32, x32, w2, gamma2, beta2)

    # ---- Pass 2: normalize + ReLU; conv HBM buffer reused in place (aliased) ----
    out = pl.pallas_call(
        _bn_relu_kernel,
        out_shape=jax.ShapeDtypeStruct((B, Co, T_out), jnp.float32),
        grid=(n_co, B, mt),
        in_specs=[
            pl.BlockSpec((1, co_t, tt), lambda c, b, m: (b, c, m)),
            pl.BlockSpec((co_t, 1), lambda c, b, m: (c, 0)),
            pl.BlockSpec((co_t, 1), lambda c, b, m: (c, 0)),
        ],
        out_specs=pl.BlockSpec((1, co_t, tt), lambda c, b, m: (b, c, m)),
        input_output_aliases={0: 0},
        compiler_params=pltpu.CompilerParams(
            dimension_semantics=("parallel", "parallel", "arbitrary"),
            vmem_limit_bytes=vmem_limit),
    )(conv, scale, shift)

    return out


def _xavier_uniform(key, shape, gain):
    # Conv1d weight [Co, Ci, K]: fan_in = Ci*K, fan_out = Co*K (PyTorch convention)
    Co, Ci, K = shape
    fan_in, fan_out = Ci * K, Co * K
    bound = gain * jnp.sqrt(6.0 / (fan_in + fan_out))
    return jax.random.uniform(key, shape, jnp.float32, -bound, bound)


def _reference(x, weight, gamma, beta):
    # pure-JAX reference: valid conv1d + training-mode BatchNorm1d + ReLU
    out = jax.lax.conv_general_dilated(
        x, weight, window_strides=(1,), padding="VALID",
        dimension_numbers=("NCH", "OIH", "NCH"))
    mean = jnp.mean(out, axis=(0, 2), keepdims=True)
    var = jnp.mean((out - mean) ** 2, axis=(0, 2), keepdims=True)
    y = (out - mean) * jax.lax.rsqrt(var + EPS)
    y = y * gamma[None, :, None] + beta[None, :, None]
    return jnp.maximum(y, 0.0)


if __name__ == "__main__":
    B, Ci, Co, T, K = 2, 4, 8, 16, 5

    key = jax.random.PRNGKey(0)
    k_x, k_w = jax.random.split(key)

    x = jax.random.normal(k_x, (B, Ci, T), dtype=jnp.float32)
    # xavier_uniform_ with gain = calculate_gain('relu') = sqrt(2)
    weight = _xavier_uniform(k_w, (Co, Ci, K), gain=jnp.sqrt(2.0))
    gamma = jnp.ones((Co,), dtype=jnp.float32)   # BatchNorm1d default weight
    beta = jnp.zeros((Co,), dtype=jnp.float32)   # BatchNorm1d default bias

    out = conv1d_bn_relu(x, weight, gamma, beta, kernel_size=K)
    out = jax.block_until_ready(out)

    ref = _reference(x, weight, gamma, beta)
    assert out.shape == (B, Co, T - K + 1), out.shape
    max_err = float(jnp.max(jnp.abs(out - ref)))
    assert max_err < 5e-4, max_err

    print("KERNEL_OK")
</pallas_src>

<mosaic_0001>
module attributes {stable_mosaic.version = 11 : i64} {
  func.func @_conv_stats_kernel(%arg0: i32, %arg1: i32, %arg2: i32, %arg3: memref<1x4x128xf32, #tpu.memory_space<vmem>>, %arg4: memref<1x4x128xf32, #tpu.memory_space<vmem>>, %arg5: memref<8x20xf32, #tpu.memory_space<vmem>>, %arg6: memref<8x1xf32, #tpu.memory_space<vmem>>, %arg7: memref<8x1xf32, #tpu.memory_space<vmem>>, %arg8: memref<1x8x128xf32, #tpu.memory_space<vmem>>, %arg9: memref<8x1xf32, #tpu.memory_space<vmem>>, %arg10: memref<8x1xf32, #tpu.memory_space<vmem>>, %arg11: memref<20x128xf32, #tpu.memory_space<vmem>>, %arg12: memref<8x1xf32, #tpu.memory_space<vmem>>, %arg13: memref<8x1xf32, #tpu.memory_space<vmem>>) attributes {dimension_semantics = [#tpu.dimension_semantics<parallel>, #tpu.dimension_semantics<arbitrary>, #tpu.dimension_semantics<arbitrary>], iteration_bounds = array<i64: 1, 2, 1>, scalar_prefetch = 0 : i64, scratch_operands = 3 : i64, tpu.core_type = #tpu.core_type<tc>, window_params = [{transform_indices = @transform_0, window_bounds = array<i64: 1, 4, 128>}, {transform_indices = @transform_1, window_bounds = array<i64: 1, 4, 128>}, {transform_indices = @transform_2, window_bounds = array<i64: 8, 20>}, {transform_indices = @transform_3, window_bounds = array<i64: 8, 1>}, {transform_indices = @transform_4, window_bounds = array<i64: 8, 1>}, {transform_indices = @transform_5, window_bounds = array<i64: 1, 8, 128>}, {transform_indices = @transform_6, window_bounds = array<i64: 8, 1>}, {transform_indices = @transform_7, window_bounds = array<i64: 8, 1>}]} {
    %c0 = arith.constant 0 : index
    %c0_0 = arith.constant 0 : index
    %c0_1 = arith.constant 0 : index
    %0 = vector.load %arg3[%c0, %c0_0, %c0_1] : memref<1x4x128xf32, #tpu.memory_space<vmem>>, vector<1x4x128xf32>
    %1 = vector.shape_cast %0 : vector<1x4x128xf32> to vector<4x128xf32>
    %c0_2 = arith.constant 0 : index
    %c0_3 = arith.constant 0 : index
    %2 = vector.load %arg11[%c0_2, %c0_3] : memref<20x128xf32, #tpu.memory_space<vmem>>, vector<4x128xf32>
    tpu.vector_store %arg11[%c0_2, %c0_3], %1 {strides = array<i32>} : memref<20x128xf32, #tpu.memory_space<vmem>>, vector<4x128xf32>,
    %c0_4 = arith.constant 0 : index
    %c0_5 = arith.constant 0 : index
    %c0_6 = arith.constant 0 : index
    %3 = vector.load %arg4[%c0_4, %c0_5, %c0_6] : memref<1x4x128xf32, #tpu.memory_space<vmem>>, vector<1x4x128xf32>
    %4 = vector.shape_cast %3 : vector<1x4x128xf32> to vector<4x128xf32>
    %5 = vector.extract_strided_slice %1 {offsets = [0, 1], sizes = [4, 127], strides = [1, 1]} : vector<4x128xf32> to vector<4x127xf32>
    %c4 = arith.constant 4 : index
    %c0_7 = arith.constant 0 : index
    %6 = vector.load %arg11[%c4, %c0_7] : memref<20x128xf32, #tpu.memory_space<vmem>>, vector<4x127xf32>
    tpu.vector_store %arg11[%c4, %c0_7], %5 {strides = array<i32>} : memref<20x128xf32, #tpu.memory_space<vmem>>, vector<4x127xf32>,
    %7 = vector.extract_strided_slice %4 {offsets = [0, 0], sizes = [4, 1], strides = [1, 1]} : vector<4x128xf32> to vector<4x1xf32>
    %c4_8 = arith.constant 4 : index
    %c127 = arith.constant 127 : index
    %8 = vector.load %arg11[%c4_8, %c127] : memref<20x128xf32, #tpu.memory_space<vmem>>, vector<4x1xf32>
    tpu.vector_store %arg11[%c4_8, %c127], %7 {strides = array<i32>} : memref<20x128xf32, #tpu.memory_space<vmem>>, vector<4x1xf32>,
    %9 = vector.extract_strided_slice %1 {offsets = [0, 2], sizes = [4, 126], strides = [1, 1]} : vector<4x128xf32> to vector<4x126xf32>
    %c8 = arith.constant 8 : index
    %c0_9 = arith.constant 0 : index
    %10 = vector.load %arg11[%c8, %c0_9] : memref<20x128xf32, #tpu.memory_space<vmem>>, vector<4x126xf32>
    tpu.vector_store %arg11[%c8, %c0_9], %9 {strides = array<i32>} : memref<20x128xf32, #tpu.memory_space<vmem>>, vector<4x126xf32>,
    %11 = vector.extract_strided_slice %4 {offsets = [0, 0], sizes = [4, 2], strides = [1, 1]} : vector<4x128xf32> to vector<4x2xf32>
    %c8_10 = arith.constant 8 : index
    %c126 = arith.constant 126 : index
    %12 = vector.load %arg11[%c8_10, %c126] : memref<20x128xf32, #tpu.memory_space<vmem>>, vector<4x2xf32>
    tpu.vector_store %arg11[%c8_10, %c126], %11 {strides = array<i32>} : memref<20x128xf32, #tpu.memory_space<vmem>>, vector<4x2xf32>,
    %13 = vector.extract_strided_slice %1 {offsets = [0, 3], sizes = [4, 125], strides = [1, 1]} : vector<4x128xf32> to vector<4x125xf32>
    %c12 = arith.constant 12 : index
    %c0_11 = arith.constant 0 : index
    %14 = vector.load %arg11[%c12, %c0_11] : memref<20x128xf32, #tpu.memory_space<vmem>>, vector<4x125xf32>
    tpu.vector_store %arg11[%c12, %c0_11], %13 {strides = array<i32>} : memref<20x128xf32, #tpu.memory_space<vmem>>, vector<4x125xf32>,
    %15 = vector.extract_strided_slice %4 {offsets = [0, 0], sizes = [4, 3], strides = [1, 1]} : vector<4x128xf32> to vector<4x3xf32>
    %c12_12 = arith.constant 12 : index
    %c125 = arith.constant 125 : index
    %16 = vector.load %arg11[%c12_12, %c125] : memref<20x128xf32, #tpu.memory_space<vmem>>, vector<4x3xf32>
    tpu.vector_store %arg11[%c12_12, %c125], %15 {strides = array<i32>} : memref<20x128xf32, #tpu.memory_space<vmem>>, vector<4x3xf32>,
    %17 = vector.extract_strided_slice %1 {offsets = [0, 4], sizes = [4, 124], strides = [1, 1]} : vector<4x128xf32> to vector<4x124xf32>
    %c16 = arith.constant 16 : index
    %c0_13 = arith.constant 0 : index
    %18 = vector.load %arg11[%c16, %c0_13] : memref<20x128xf32, #tpu.memory_space<vmem>>, vector<4x124xf32>
    tpu.vector_store %arg11[%c16, %c0_13], %17 {strides = array<i32>} : memref<20x128xf32, #tpu.memory_space<vmem>>, vector<4x124xf32>,
    %19 = vector.extract_strided_slice %4 {offsets = [0, 0], sizes = [4, 4], strides = [1, 1]} : vector<4x128xf32> to vector<4x4xf32>
    %c16_14 = arith.constant 16 : index
    %c124 = arith.constant 124 : index
    %20 = vector.load %arg11[%c16_14, %c124] : memref<20x128xf32, #tpu.memory_space<vmem>>, vector<4x4xf32>
    tpu.vector_store %arg11[%c16_14, %c124], %19 {strides = array<i32>} : memref<20x128xf32, #tpu.memory_space<vmem>>, vector<4x4xf32>,
    %c0_15 = arith.constant 0 : index
    %c0_16 = arith.constant 0 : index
    %21 = vector.load %arg5[%c0_15, %c0_16] : memref<8x20xf32, #tpu.memory_space<vmem>>, vector<8x20xf32>
    %c0_17 = arith.constant 0 : index
    %c0_18 = arith.constant 0 : index
    %22 = vector.load %arg11[%c0_17, %c0_18] : memref<20x128xf32, #tpu.memory_space<vmem>>, vector<20x128xf32>
    %cst = arith.constant dense<0.000000e+00> : vector<8x128xf32>
    %23 = tpu.matmul %21, %22, %cst {dimension_numbers = #tpu.dot_dimension_numbers<[1], [0], [0], [1], [0, 0, 1, 1], [], []>} : vector<8x20xf32>, vector<20x128xf32>, vector<8x128xf32> -> vector<8x128xf32>
    %c0_19 = arith.constant 0 : index
    %c0_20 = arith.constant 0 : index
    %c0_21 = arith.constant 0 : index
    %24 = vector.load %arg8[%c0_19, %c0_20, %c0_21] : memref<1x8x128xf32, #tpu.memory_space<vmem>>, vector<1x8x128xf32>
    %25 = vector.shape_cast %24 : vector<1x8x128xf32> to vector<8x128xf32>
    %26 = vector.shape_cast %23 : vector<8x128xf32> to vector<1x8x128xf32>
    tpu.vector_store %arg8[%c0_19, %c0_20, %c0_21], %26 {strides = array<i32>} : memref<1x8x128xf32, #tpu.memory_space<vmem>>, vector<1x8x128xf32>,
    %c0_i32 = arith.constant 0 : i32
    %27 = arith.cmpi eq, %arg1, %c0_i32 : i32
    %c0_i32_22 = arith.constant 0 : i32
    %28 = arith.cmpi eq, %arg2, %c0_i32_22 : i32
    %29 = arith.andi %27, %28 : i1
    %30 = arith.extui %29 : i1 to i32
    %c0_i32_23 = arith.constant 0 : i32
    %31 = arith.cmpi ne, %30, %c0_i32_23 : i32
    scf.if %31 {
      %cst_30 = arith.constant 0.000000e+00 : f32
      %43 = vector.broadcast %cst_30 : f32 to vector<8x1xf32>
      %c0_31 = arith.constant 0 : index
      %c0_32 = arith.constant 0 : index
      %44 = vector.load %arg12[%c0_31, %c0_32] : memref<8x1xf32, #tpu.memory_space<vmem>>, vector<8x1xf32>
      tpu.vector_store %arg12[%c0_31, %c0_32], %43 {strides = array<i32>} : memref<8x1xf32, #tpu.memory_space<vmem>>, vector<8x1xf32>,
      %cst_33 = arith.constant 0.000000e+00 : f32
      %45 = vector.broadcast %cst_33 : f32 to vector<8x1xf32>
      %c0_34 = arith.constant 0 : index
      %c0_35 = arith.constant 0 : index
      %46 = vector.load %arg13[%c0_34, %c0_35] : memref<8x1xf32, #tpu.memory_space<vmem>>, vector<8x1xf32>
      tpu.vector_store %arg13[%c0_34, %c0_35], %45 {strides = array<i32>} : memref<8x1xf32, #tpu.memory_space<vmem>>, vector<8x1xf32>,
    } else {
    }
    %c0_i32_24 = arith.constant 0 : i32
    %32 = arith.cmpi slt, %arg2, %c0_i32_24 : i32
    %33 = arith.extui %32 : i1 to i32
    %c0_i32_25 = arith.constant 0 : i32
    %34 = arith.cmpi ne, %33, %c0_i32_25 : i32
    scf.if %34 {
      %c0_30 = arith.constant 0 : index
      %c0_31 = arith.constant 0 : index
      %43 = vector.load %arg12[%c0_30, %c0_31] : memref<8x1xf32, #tpu.memory_space<vmem>>, vector<8x1xf32>
      %cst_32 = arith.constant dense<0.000000e+00> : vector<8xf32>
      %44 = vector.multi_reduction <add>, %23, %cst_32 [1] : vector<8x128xf32> to vector<8xf32>
      %45 = vector.shape_cast %44 : vector<8xf32> to vector<8x1xf32>
      %46 = arith.addf %43, %45 : vector<8x1xf32>
      %c0_33 = arith.constant 0 : index
      %c0_34 = arith.constant 0 : index
      %47 = vector.load %arg12[%c0_33, %c0_34] : memref<8x1xf32, #tpu.memory_space<vmem>>, vector<8x1xf32>
      tpu.vector_store %arg12[%c0_33, %c0_34], %46 {strides = array<i32>} : memref<8x1xf32, #tpu.memory_space<vmem>>, vector<8x1xf32>,
      %c0_35 = arith.constant 0 : index
      %c0_36 = arith.constant 0 : index
      %48 = vector.load %arg13[%c0_35, %c0_36] : memref<8x1xf32, #tpu.memory_space<vmem>>, vector<8x1xf32>
      %49 = arith.mulf %23, %23 : vector<8x128xf32>
      %cst_37 = arith.constant dense<0.000000e+00> : vector<8xf32>
      %50 = vector.multi_reduction <add>, %49, %cst_37 [1] : vector<8x128xf32> to vector<8xf32>
      %51 = vector.shape_cast %50 : vector<8xf32> to vector<8x1xf32>
      %52 = arith.addf %48, %51 : vector<8x1xf32>
      %c0_38 = arith.constant 0 : index
      %c0_39 = arith.constant 0 : index
      %53 = vector.load %arg13[%c0_38, %c0_39] : memref<8x1xf32, #tpu.memory_space<vmem>>, vector<8x1xf32>
      tpu.vector_store %arg13[%c0_38, %c0_39], %52 {strides = array<i32>} : memref<8x1xf32, #tpu.memory_space<vmem>>, vector<8x1xf32>,
    } else {
    }
    %c0_i32_26 = arith.constant 0 : i32
    %35 = arith.cmpi eq, %arg2, %c0_i32_26 : i32
    %36 = arith.extui %35 : i1 to i32
    %c0_i32_27 = arith.constant 0 : i32
    %37 = arith.cmpi ne, %36, %c0_i32_27 : i32
    scf.if %37 {
      %43 = tpu.iota {dimensions = array<i32: 1>} : vector<1x128xi32>
      %c128_i32 = arith.constant 128 : i32
      %44 = arith.muli %arg2, %c128_i32 : i32
      %45 = vector.broadcast %44 : i32 to vector<1x128xi32>
      %46 = arith.addi %43, %45 : vector<1x128xi32>
      %c12_i32 = arith.constant 12 : i32
      %47 = vector.broadcast %c12_i32 : i32 to vector<1x128xi32>
      %48 = arith.cmpi slt, %46, %47 : vector<1x128xi32>
      %cst_30 = arith.constant 0.000000e+00 : f32
      %49 = vector.shape_cast %48 : vector<1x128xi1> to vector<1x128xi1>
      %50 = vector.broadcast %49 : vector<1x128xi1> to vector<8x128xi1>
      %51 = vector.broadcast %cst_30 : f32 to vector<8x128xf32>
      %52 = arith.select %50, %23, %51 : vector<8x128xi1>, vector<8x128xf32>
      %c0_31 = arith.constant 0 : index
      %c0_32 = arith.constant 0 : index
      %53 = vector.load %arg12[%c0_31, %c0_32] : memref<8x1xf32, #tpu.memory_space<vmem>>, vector<8x1xf32>
      %cst_33 = arith.constant dense<0.000000e+00> : vector<8xf32>
      %54 = vector.multi_reduction <add>, %52, %cst_33 [1] : vector<8x128xf32> to vector<8xf32>
      %55 = vector.shape_cast %54 : vector<8xf32> to vector<8x1xf32>
      %56 = arith.addf %53, %55 : vector<8x1xf32>
      %c0_34 = arith.constant 0 : index
      %c0_35 = arith.constant 0 : index
      %57 = vector.load %arg12[%c0_34, %c0_35] : memref<8x1xf32, #tpu.memory_space<vmem>>, vector<8x1xf32>
      tpu.vector_store %arg12[%c0_34, %c0_35], %56 {strides = array<i32>} : memref<8x1xf32, #tpu.memory_space<vmem>>, vector<8x1xf32>,
      %c0_36 = arith.constant 0 : index
      %c0_37 = arith.constant 0 : index
      %58 = vector.load %arg13[%c0_36, %c0_37] : memref<8x1xf32, #tpu.memory_space<vmem>>, vector<8x1xf32>
      %59 = arith.mulf %52, %52 : vector<8x128xf32>
      %cst_38 = arith.constant dense<0.000000e+00> : vector<8xf32>
      %60 = vector.multi_reduction <add>, %59, %cst_38 [1] : vector<8x128xf32> to vector<8xf32>
      %61 = vector.shape_cast %60 : vector<8xf32> to vector<8x1xf32>
      %62 = arith.addf %58, %61 : vector<8x1xf32>
      %c0_39 = arith.constant 0 : index
      %c0_40 = arith.constant 0 : index
      %63 = vector.load %arg13[%c0_39, %c0_40] : memref<8x1xf32, #tpu.memory_space<vmem>>, vector<8x1xf32>
      tpu.vector_store %arg13[%c0_39, %c0_40], %62 {strides = array<i32>} : memref<8x1xf32, #tpu.memory_space<vmem>>, vector<8x1xf32>,
    } else {
    }
    %c1_i32 = arith.constant 1 : i32
    %38 = arith.cmpi eq, %arg1, %c1_i32 : i32
    %c0_i32_28 = arith.constant 0 : i32
    %39 = arith.cmpi eq, %arg2, %c0_i32_28 : i32
    %40 = arith.andi %38, %39 : i1
    %41 = arith.extui %40 : i1 to i32
    %c0_i32_29 = arith.constant 0 : i32
    %42 = arith.cmpi ne, %41, %c0_i32_29 : i32
    scf.if %42 {
      %c0_30 = arith.constant 0 : index
      %c0_31 = arith.constant 0 : index
      %43 = vector.load %arg12[%c0_30, %c0_31] : memref<8x1xf32, #tpu.memory_space<vmem>>, vector<8x1xf32>
      %cst_32 = arith.constant 0.0416666679 : f32
      %44 = vector.broadcast %cst_32 : f32 to vector<8x1xf32>
      %45 = arith.mulf %43, %44 : vector<8x1xf32>
      %c0_33 = arith.constant 0 : index
      %c0_34 = arith.constant 0 : index
      %46 = vector.load %arg13[%c0_33, %c0_34] : memref<8x1xf32, #tpu.memory_space<vmem>>, vector<8x1xf32>
      %cst_35 = arith.constant 0.0416666679 : f32
      %47 = vector.broadcast %cst_35 : f32 to vector<8x1xf32>
      %48 = arith.mulf %46, %47 : vector<8x1xf32>
      %49 = arith.mulf %45, %45 : vector<8x1xf32>
      %50 = arith.subf %48, %49 : vector<8x1xf32>
      %c0_36 = arith.constant 0 : index
      %c0_37 = arith.constant 0 : index
      %51 = vector.load %arg6[%c0_36, %c0_37] : memref<8x1xf32, #tpu.memory_space<vmem>>, vector<8x1xf32>
      %cst_38 = arith.constant 9.99999974E-6 : f32
      %52 = vector.broadcast %cst_38 : f32 to vector<8x1xf32>
      %53 = arith.addf %50, %52 : vector<8x1xf32>
      %54 = math.rsqrt %53 : vector<8x1xf32>
      %55 = arith.mulf %51, %54 : vector<8x1xf32>
      %c0_39 = arith.constant 0 : index
      %c0_40 = arith.constant 0 : index
      %56 = vector.load %arg9[%c0_39, %c0_40] : memref<8x1xf32, #tpu.memory_space<vmem>>, vector<8x1xf32>
      tpu.vector_store %arg9[%c0_39, %c0_40], %55 {strides = array<i32>} : memref<8x1xf32, #tpu.memory_space<vmem>>, vector<8x1xf32>,
      %c0_41 = arith.constant 0 : index
      %c0_42 = arith.constant 0 : index
      %57 = vector.load %arg7[%c0_41, %c0_42] : memref<8x1xf32, #tpu.memory_space<vmem>>, vector<8x1xf32>
      %58 = arith.mulf %45, %55 : vector<8x1xf32>
      %59 = arith.subf %57, %58 : vector<8x1xf32>
      %c0_43 = arith.constant 0 : index
      %c0_44 = arith.constant 0 : index
      %60 = vector.load %arg10[%c0_43, %c0_44] : memref<8x1xf32, #tpu.memory_space<vmem>>, vector<8x1xf32>
      tpu.vector_store %arg10[%c0_43, %c0_44], %59 {strides = array<i32>} : memref<8x1xf32, #tpu.memory_space<vmem>>, vector<8x1xf32>,
    } else {
    }
    return
  }
  func.func @transform_0(%arg0: i32, %arg1: i32, %arg2: i32) -> (i32, i32, i32) {
    %c0_i32 = arith.constant 0 : i32
    %c0_i32_0 = arith.constant 0 : i32
    return %arg1, %c0_i32, %arg2 : i32, i32, i32
  }
  func.func @transform_1(%arg0: i32, %arg1: i32, %arg2: i32) -> (i32, i32, i32) {
    %c1_i32 = arith.constant 1 : i32
    %0 = arith.addi %arg2, %c1_i32 : i32
    %c1_i32_0 = arith.constant 1 : i32
    %1 = arith.muli %0, %c1_i32_0 : i32
    %c0_i32 = arith.constant 0 : i32
    %2 = arith.minsi %1, %c0_i32 : i32
    %c0_i32_1 = arith.constant 0 : i32
    %c0_i32_2 = arith.constant 0 : i32
    return %arg1, %c0_i32_1, %2 : i32, i32, i32
  }
  func.func @transform_2(%arg0: i32, %arg1: i32, %arg2: i32) -> (i32, i32) {
    %c0_i32 = arith.constant 0 : i32
    %c0_i32_0 = arith.constant 0 : i32
    return %arg0, %c0_i32 : i32, i32
  }
  func.func @transform_3(%arg0: i32, %arg1: i32, %arg2: i32) -> (i32, i32) {
    %c0_i32 = arith.constant 0 : i32
    %c0_i32_0 = arith.constant 0 : i32
    return %arg0, %c0_i32 : i32, i32
  }
  func.func @transform_4(%arg0: i32, %arg1: i32, %arg2: i32) -> (i32, i32) {
    %c0_i32 = arith.constant 0 : i32
    %c0_i32_0 = arith.constant 0 : i32
    return %arg0, %c0_i32 : i32, i32
  }
  func.func @transform_5(%arg0: i32, %arg1: i32, %arg2: i32) -> (i32, i32, i32) {
    %c0_i32 = arith.constant 0 : i32
    return %arg1, %arg0, %arg2 : i32, i32, i32
  }
  func.func @transform_6(%arg0: i32, %arg1: i32, %arg2: i32) -> (i32, i32) {
    %c0_i32 = arith.constant 0 : i32
    %c0_i32_0 = arith.constant 0 : i32
    return %arg0, %c0_i32 : i32, i32
  }
  func.func @transform_7(%arg0: i32, %arg1: i32, %arg2: i32) -> (i32, i32) {
    %c0_i32 = arith.constant 0 : i32
    %c0_i32_0 = arith.constant 0 : i32
    return %arg0, %c0_i32 : i32, i32
  }
}

module attributes {stable_mosaic.version = 11 : i64} {
  func.func @_bn_relu_kernel(%arg0: i32, %arg1: i32, %arg2: i32, %arg3: memref<1x8x128xf32, #tpu.memory_space<vmem>>, %arg4: memref<8x1xf32, #tpu.memory_space<vmem>>, %arg5: memref<8x1xf32, #tpu.memory_space<vmem>>, %arg6: memref<1x8x128xf32, #tpu.memory_space<vmem>>) attributes {dimension_semantics = [#tpu.dimension_semantics<parallel>, #tpu.dimension_semantics<parallel>, #tpu.dimension_semantics<arbitrary>], iteration_bounds = array<i64: 1, 2, 1>, scalar_prefetch = 0 : i64, scratch_operands = 0 : i64, tpu.core_type = #tpu.core_type<tc>, window_params = [{transform_indices = @transform_0, window_bounds = array<i64: 1, 8, 128>}, {transform_indices = @transform_1, window_bounds = array<i64: 8, 1>}, {transform_indices = @transform_2, window_bounds = array<i64: 8, 1>}, {transform_indices = @transform_3, window_bounds = array<i64: 1, 8, 128>}]} {
    %c0 = arith.constant 0 : index
    %c0_0 = arith.constant 0 : index
    %c0_1 = arith.constant 0 : index
    %0 = vector.load %arg3[%c0, %c0_0, %c0_1] : memref<1x8x128xf32, #tpu.memory_space<vmem>>, vector<1x8x128xf32>
    %1 = vector.shape_cast %0 : vector<1x8x128xf32> to vector<8x128xf32>
    %c0_2 = arith.constant 0 : index
    %c0_3 = arith.constant 0 : index
    %2 = vector.load %arg4[%c0_2, %c0_3] : memref<8x1xf32, #tpu.memory_space<vmem>>, vector<8x1xf32>
    %3 = vector.broadcast %2 : vector<8x1xf32> to vector<8x128xf32>
    %4 = arith.mulf %1, %3 : vector<8x128xf32>
    %c0_4 = arith.constant 0 : index
    %c0_5 = arith.constant 0 : index
    %5 = vector.load %arg5[%c0_4, %c0_5] : memref<8x1xf32, #tpu.memory_space<vmem>>, vector<8x1xf32>
    %6 = vector.broadcast %5 : vector<8x1xf32> to vector<8x128xf32>
    %7 = arith.addf %4, %6 : vector<8x128xf32>
    %cst = arith.constant 0.000000e+00 : f32
    %8 = vector.broadcast %cst : f32 to vector<8x128xf32>
    %9 = arith.maximumf %7, %8 : vector<8x128xf32>
    %c0_6 = arith.constant 0 : index
    %c0_7 = arith.constant 0 : index
    %c0_8 = arith.constant 0 : index
    %10 = vector.load %arg6[%c0_6, %c0_7, %c0_8] : memref<1x8x128xf32, #tpu.memory_space<vmem>>, vector<1x8x128xf32>
    %11 = vector.shape_cast %10 : vector<1x8x128xf32> to vector<8x128xf32>
    %12 = vector.shape_cast %9 : vector<8x128xf32> to vector<1x8x128xf32>
    tpu.vector_store %arg6[%c0_6, %c0_7, %c0_8], %12 {strides = array<i32>} : memref<1x8x128xf32, #tpu.memory_space<vmem>>, vector<1x8x128xf32>,
    return
  }
  func.func @transform_0(%arg0: i32, %arg1: i32, %arg2: i32) -> (i32, i32, i32) {
    %c0_i32 = arith.constant 0 : i32
    return %arg1, %arg0, %arg2 : i32, i32, i32
  }
  func.func @transform_1(%arg0: i32, %arg1: i32, %arg2: i32) -> (i32, i32) {
    %c0_i32 = arith.constant 0 : i32
    %c0_i32_0 = arith.constant 0 : i32
    return %arg0, %c0_i32 : i32, i32
  }
  func.func @transform_2(%arg0: i32, %arg1: i32, %arg2: i32) -> (i32, i32) {
    %c0_i32 = arith.constant 0 : i32
    %c0_i32_0 = arith.constant 0 : i32
    return %arg0, %c0_i32 : i32, i32
  }
  func.func @transform_3(%arg0: i32, %arg1: i32, %arg2: i32) -> (i32, i32, i32) {
    %c0_i32 = arith.constant 0 : i32
    return %arg1, %arg0, %arg2 : i32, i32, i32
  }
}

</mosaic_0001>

<bundles_post_ra>
// kernel: conv1d_bn_relu.2
= control target key start
LH: loop header
LB: loop body
LE: loop exit
PB: predicated region body
PF: predicated region fallthrough
CT: control target
= control target key end

     0   :  { %s1139_s0 = inlined_call_operand.vmem [shape: f32[2,4,16], index: 0, kind: input, shape index: {}, may-alias: {0,1}]   ;;  %s1140_s1 = inlined_call_operand.vmem [shape: f32[2,4,16], index: 1, kind: input, shape index: {}, may-alias: {0,1}]   ;;  %s1141_s2 = inlined_call_operand.vmem [shape: f32[8,20], index: 2, kind: input, shape index: {}]   ;;  %s1142_s3 = inlined_call_operand.vmem [shape: f32[8,1], index: 3, kind: input, shape index: {}]   ;;  %s1143_s4 = inlined_call_operand.vmem [shape: f32[8,1], index: 4, kind: input, shape index: {}]   ;;  %s1144_s5 = inlined_call_operand.hbm [shape: f32[2,8,12], index: 5, kind: output, shape index: {0}]   ;;  %s1145_s6 = inlined_call_operand.vmem [shape: f32[8,1], index: 6, kind: output, shape index: {1}]   ;;  %s1146_s7 = inlined_call_operand.vmem [shape: f32[8,1], index: 7, kind: output, shape index: {2}]  }
   0x1   :  { %1147 = sst [smem:[#allocation8_spill]] %s1139_s0 }
   0x2   :  { %13 = vsyncpa [#allocation6], 0 }
   0x3   :  { %15 = vsyncpa [#allocation6 + $0x1], 0  ;;  %s1005_s24 = smov 0   ;;  %s1007_s25 = smov 0  }
   0x4   :  { %s1009_s26 = smov 0   ;;  %s1011_s27 = smov 0  }
   0x5   :  { %s1013_s28 = smov 0   ;;  %s1015_s29 = smov 0  }
   0x6 LB: > { %s795_s30 = sadd.s32 4294967295, %s958_s29   ;;  %s796_s8 = sadd.s32 4294967294, %s958_s29   ;;  %s958_s29 = sphi %s1015_s29, %s21_s29   ;;  %s954_s28 = sphi %s1013_s28, %s1155_s28   ;;  %s950_s27 = sphi %s1011_s27, %s1154_s27   ;;  %s946_s26 = sphi %s1009_s26, %s1153_s26   ;;  %s942_s25 = sphi %s1007_s25, %s1152_s25   ;;  %s938_s24 = sphi %s1005_s24, %s1151_s24  }
   0x7   : > { %s36_s9 = sadd.s32 1, %s954_s28  ;;  %s191_s10 = sadd.s32 1, %s946_s26 }
   0x8   : > { %p38_p0 = scmp.ge.s32.totalorder %s36_s9, 2  ;;  %p201_p1 = scmp.ne.s32.totalorder %s946_s26, %s942_s25 }
   0x9   : > { %p202_p2 = scmp.eq.s32.totalorder %s795_s30, 1  ;;  %p207_p3 = scmp.ne.s32.totalorder %s942_s25, %s938_s24 }
   0xa   : > { %s1157_s9 = smov (%p38_p0, %s36_s9), 0  ;;  %p208_p5 = scmp.eq.s32.totalorder %s796_s8, 1 }
   0xb   : > { %p1045_p4 = por %p202_p2, %p201_p1  ;;  %s184_s12 = ssub.s32 %s954_s28, %s1157_s9 }
   0xc   : > { %p802_p6 = scmp.ge.s32.totalorder %s958_s29, 1  ;;  %p189_p7 = scmp.eq.s32.totalorder %s184_s12, 0 }
   0xd   : > { %p1052_p8 = por %p208_p5, %p207_p3  ;;  %p325_p9 = scmp.lt.s32.totalorder %s958_s29, 3 }
   0xe   : > { %s1058_s14 = scalar_select %p189_p7, %s946_s26, %s191_s10  }
   0xf   : > { %p326_p10 = pnand %p802_p6, %p325_p9 }
  0x10   : > { %p389_p11 = scmp.lt.s32.totalorder (!%p326_p10), %s950_s27, 1  ;;  %s1150_s0 = sld [smem:[#allocation8_spill]] (!%p326_p10) }
  0x11   : > { %329 = sbr.rel (%p326_p10) target bundleno = 481 (0x1e1), region = 40  ;;  %s960_s23 = smov (!%p326_p10), 126  }
  0x12   : > { %s961_s30 = smov (!%p326_p10), 124   ;;  %s962_s8 = smov (!%p326_p10), 125  }
  0x13   : > { %s963_s10 = smov (!%p326_p10), 127   ;;  %p507_p12 = scmp.eq.s32.totalorder (!%p326_p10), %s950_s27, 0 }
  0x16   : > { %s390_s15 = scalar_select %p389_p11, %s950_s27, 1  ;;  %vm447_vm0 = vcmask 1027072   ;;  %vm467_vm1 = vcmask 1010688   ;;  %vm452_vm2 = vcmask 1044464   ;;  %vm457_vm3 = vcmask 1018880   ;;  %v474_v12 = vld [vmem:[%s1141_s2] sm:$0xff] }
  0x17   : > { %vm472_vm4 = vcmask 1044448   ;;  %vm462_vm5 = vcmask 1044456   ;;  %vm436_vm6 = vcmask 1035264   ;;  %vm442_vm7 = vcmask 1044472  }
  0x18   : > { %s804_s16 = sshll.u32 %s390_s15, 2  ;;  %vm482_vm8 = vcmask 1043456   ;;  %vm478_vm9 = vcmask 162816   ;;  %vm513_vm10 = vcmask (%p507_p12), 7168   ;;  %v964_v15 = vmov (%p507_p12), 0.0  }
  0x19   : > { %s395_s19 = scalar_lea.vmem %s1150_s0, %s804_s16  ;;  %s405_s22 = scalar_lea.vmem %s1140_s1, %s804_s16  ;;  %514 = vst.msk [vmem:[#allocation3] sm:$0xff] (%p507_p12), %vm513_vm10, %v964_v15 }
  0x1a   : > { %v429_v0 = vld [vmem:[%s395_s19] sm:$0xf]  ;;  %s374_s16 = sand.u32 1, %s942_s25   ;;  %515 = vst.msk [vmem:[#allocation4] sm:$0xff] (%p507_p12), %vm513_vm10, %v964_v15 }
  0x1b   : > { %444 = vrot.lane.b32.xlu1 %v429_v0, %s960_s23  ;;  %430 = vst [vmem:[#allocation2] sm:$0xf] %v429_v0  ;;  %464 = vrot.lane.b32.xlu0 %v429_v0, %s961_s30  ;;  %v431_v1 = vld [vmem:[%s405_s22] sm:$0xf]  ;;  %s1075_s17 = sshll.u32 %s374_s16, 3 }
  0x1c   : > { %449 = vrot.lane.b32.xlu2 %v431_v1, %s960_s23  ;;  %s376_s18 = scalar_lea.vmem [#allocation5], %s1075_s17 }
  0x23   : > { %454 = vrot.lane.b32.xlu1 %v429_v0, %s962_s8  ;;  %469 = vrot.lane.b32.xlu0 %v431_v1, %s961_s30 }
  0x24   : > { %459 = vrot.lane.b32.xlu2 %v431_v1, %s962_s8 }
  0x2b   : > { %433 = vrot.lane.b32.xlu0 %v429_v0, %s963_s10  ;;  %439 = vrot.lane.b32.xlu1 %v431_v1, %s963_s10 }
  0x76   : > { %v450_v2 = vpop.permute.xlu2 %449 }
  0x7e   : > { %v460_v5 = vpop.permute.xlu2 %459 }
  0x8d   : > { %v445_v3 = vpop.permute.xlu1 %444  ;;  %v465_v4 = vpop.permute.xlu0 %464 }
  0x8e   : > { %448 = vst.msk [vmem:[#allocation2 + $0x8] sm:$0xf] %vm447_vm0, %v445_v3 }
  0x8f   : > { %468 = vst.msk [vmem:[#allocation2 + $0x10] sm:$0xf] %vm467_vm1, %v465_v4 }
  0x90   : > { %453 = vst.msk [vmem:[#allocation2 + $0x8] sm:$0xf] %vm452_vm2, %v450_v2 }
  0x95   : > { %v455_v6 = vpop.permute.xlu1 %454  ;;  %v470_v7 = vpop.permute.xlu0 %469 }
  0x96   : > { %458 = vst.msk [vmem:[#allocation2 + $0xc] sm:$0xf] %vm457_vm3, %v455_v6 }
  0x97   : > { %473 = vst.msk [vmem:[#allocation2 + $0x10] sm:$0xf] %vm472_vm4, %v470_v7 }
  0x98   : > { %463 = vst.msk [vmem:[#allocation2 + $0xc] sm:$0xf] %vm462_vm5, %v460_v5 }
  0x9d   : > { %v434_v8 = vpop.permute.xlu0 %433  ;;  %v440_v9 = vpop.permute.xlu1 %439 }
  0x9e   : > { %437 = vst.msk [vmem:[#allocation2 + $0x4] sm:$0xf] %vm436_vm6, %v434_v8  ;;  %v477_v10 = vld [vmem:[#allocation2 + $0x10] sm:$0xf] }
  0x9f   : > { %443 = vst.msk [vmem:[#allocation2 + $0x4] sm:$0xf] %vm442_vm7, %v440_v9  ;;  %806 = vmatpush.msk.msra.mxu0 %vm482_vm8, %v477_v10  ;;  %v476_v11 = vld [vmem:[#allocation2 + $0x8] sm:$0xff] }
  0xa1   : > { %500 = vmatpush.msra.mxu0 %v476_v11 }
  0xa6   : > { %v475_v13 = vld [vmem:[#allocation2] sm:$0xff] }
  0xa7   : > { %501 = vmatpush.msra.mxu0 %v475_v13 }
  0xa8   : > { %807 = vmatmul.msk.f32.vlgmr.msra.gmra.mxu0 %vm478_vm9, %v474_v12 }
 0x122   : > { %512 = sbr.rel (!%p507_p12) target bundleno = 295 (0x127), region = 44 }
 0x125   : > { %v503_v14 = vpop.f32.mrf.mxu0 }
 0x126   : > { %506 = vst [vmem:[%s376_s18] sm:$0xff] %v503_v14 }
 0x127 PF: > { %v535_v16 = vlaneseq  ;;  %p556_p13 = scmp.eq.s32.totalorder %s950_s27, 1  ;;  %v544_v20 = vld [vmem:[#allocation3] sm:$0xff]  ;;  %vm548_vm12 = vcmask 7168   ;;  %v550_v23 = vld [vmem:[#allocation4] sm:$0xff] }
 0x128   : > { %v567_v38 = vld [vmem:[%s1142_s3] sm:$0xff] (%p556_p13) }
 0x129   : > { %v536_v17 = vand.u32 127, %v535_v16  ;;  %v582_v42 = vld [vmem:[%s1143_s4] sm:$0xff] (%p556_p13) }
 0x12b   : > { %vm540_vm11 = vcmp.lt.s32.totalorder %v536_v17, 12 }
 0x12c   : > { %v543_v18 = vsel %vm540_vm11, %v503_v14, 0.0 }
 0x12d   : > { %545 = vadd.xlane.f32.xlu0 %v543_v18  ;;  %v551_v19 = vmul.f32 %v543_v18, %v543_v18 }
 0x135   : > { %552 = vadd.xlane.f32.xlu0 %v551_v19 }
 0x1a0   : > { %v546_v21 = vpop.xlane.xlu0 %545 }
 0x1a1   : > { %v547_v22 = vadd.f32 %v546_v21, %v544_v20 }
 0x1a3   : > { %549 = vst.msk [vmem:[#allocation3] sm:$0xff] %vm548_vm12, %v547_v22 }
 0x1a7   : > { %560 = sbr.rel (!%p556_p13) target bundleno = 466 (0x1d2), region = 56 }
 0x1a8   : > { %v553_v24 = vpop.xlane.xlu0 %552 }
 0x1a9   : > { %v554_v25 = vadd.f32 %v553_v24, %v550_v23 }
 0x1aa   : > { %v561_v26 = vld [vmem:[#allocation3] sm:$0xff] (%p556_p13) }
 0x1ab   : > { %555 = vst.msk [vmem:[#allocation4] sm:$0xff] %vm548_vm12, %v554_v25  ;;  %v562_v28 = vmul.f32 (%p556_p13), 0.041666668, %v561_v26 }
 0x1ad   : > { %v565_v30 = vmul.f32 %v562_v28, %v562_v28 }
 0x1b2   : > { %v563_v27 = vld [vmem:[#allocation4] sm:$0xff] }
 0x1b3   : > { %v564_v29 = vmul.f32 0.041666668, %v563_v27 }
 0x1b5   : > { %v566_v31 = vsub.f32 %v564_v29, %v565_v30 }
 0x1b7   : > { %v568_v32 = vadd.f32 1e-05, %v566_v31 }
 0x1b9   : > { %878 = vrsqrt.f32 %v568_v32  ;;  %vm575_vm13 = vweird.f32 %v568_v32 }
 0x1bf   : > { %v879_v33 = vpop.eup %878 }
 0x1c0   : > { %v570_v34 = vmul.f32 %v879_v33, %v568_v32  ;;  %vm576_vm14 = vweird.f32 %v879_v33 }
 0x1c1   : > { %vm577_vm15 = vmor %vm575_vm13, %vm576_vm14 }
 0x1c2   : > { %v571_v35 = vmul.f32 %v879_v33, %v570_v34 }
 0x1c4   : > { %v572_v36 = vmul.f32 0.5, %v571_v35 }
 0x1c6   : > { %v573_v37 = vsub.f32 1.5, %v572_v36 }
 0x1c8   : > { %v574_v39 = vmul.f32 %v879_v33, %v573_v37 }
 0x1ca   : > { %v578_v40 = vsel %vm577_vm15, %v879_v33, %v574_v39 }
 0x1cb   : > { %v579_v41 = vmul.f32 %v578_v40, %v567_v38 }
 0x1cd   : > { %581 = vst.msk [vmem:[%s1145_s6] sm:$0xff] %vm548_vm12, %v579_v41  ;;  %v583_v43 = vmul.f32 %v579_v41, %v562_v28 }
 0x1cf   : > { %v584_v44 = vsub.f32 %v582_v42, %v583_v43 }
 0x1d1   : > { %585 = vst.msk [vmem:[%s1146_s7] sm:$0xff] %vm548_vm12, %v584_v44 }
 0x1d2 PF: > { %s811_s12 = sshll.u32 %s950_s27, 3  ;;  %s609_s21 = sshll.u32 %s376_s18, 4  ;;  %s610_s21 = int_to_ptr.vmem [resolvable:$true] %s609_s21 }
 0x1d3   : > { %s607_s20 = scalar_lea.hbm %s1144_s5, %s811_s12  ;;  %s587_s23 = scalar_lea.sflag [#allocation6], %s374_s16 }
 0x1d4   : > { %s611_s22 = sshll.u32 %s607_s20, 4  ;;  %s900_s0 = scalar_lea.hbm %s1144_s5, 16  ;;  %s612_s22 = int_to_ptr.hbm [resolvable:$true] %s611_s22 }
 0x1d5   : > { %s894_s30 = sshra.s32 %s612_s22, 4  ;;  %s895_s30 = int_to_ptr.hbm [resolvable:$true] %s894_s30 }
 0x1d6   : > { %s896_s8 = scalar_lea.hbm %s895_s30, 8  ;;  %p901_p3 = scmp.lt.s32.totalorder %s895_s30, %s1144_s5 }
 0x1d7   : > { %p897_p0 = scmp.ne.s32.totalorder %s895_s30, %s896_s8  ;;  %p902_p5 = scmp.lt.s32.totalorder %s900_s0, %s896_s8 }
 0x1d9   : > { %p898_p1 = pnand %p897_p0, %p1045_p4  ;;  %p903_p6 = por %p902_p5, %p901_p3 }
 0x1db   : > { %p899_p2 = pneg %p898_p1 }
 0x1dd   : > { %p904_p7 = pnand %p903_p6, %p899_p2 }
 0x1df   : > { %907 = shalt.err (!%p904_p7)
}
 0x1e0   : > { %818 = dma.vmem_to_hbm [thread:$0]  (%p1045_p4), %s610_s21, 128, %s612_s22, %s587_s23  }
 0x1e1 PF: > { %p824_p9 = scmp.ge.s32.totalorder %s958_s29, 2  ;;  %s643_s16 = sand.u32 1, %s938_s24  }
 0x1e2   : > { %s644_s17 = scalar_lea.sflag [#allocation6], %s643_s16 }
 0x1e3   : > { %p821_p10 = pnand %p824_p9, %p1052_p8 }
 0x1e5   : > { %p822_p11 = pneg %p821_p10 }
 0x1e7   : > { %933 = dma.done.wait (%p822_p11), %s644_s17, 128  }
 0x1e8   : > { %935 = vsyncadd (%p822_p11), %s644_s17, 4294967168  ;;  %s21_s29 = sadd.s32 1, %s958_s29   ;;  %s1151_s24 = smov %s942_s25 }
 0x1e9   : > { %p18_p12 = scmp.ge.s32.totalorder %s21_s29, 4   ;;  %s1152_s25 = smov %s946_s26 }
 0x1ea   : > { %s1153_s26 = smov %s1058_s14  ;;  %s1154_s27 = smov %s954_s28 }
 0x1eb   : > { %s1155_s28 = smov %s1157_s9  ;;  %20 = sbr.rel (!%p18_p12) target bundleno = 6 (0x6), region = 127 }
 0x1f0   :  { %650 = vsyncpa [#allocation6], 1 }
 0x1f1   :  { %652 = vsyncpa [#allocation6 + $0x1], 1 }

// kernel: conv1d_bn_relu.3
= control target key start
LH: loop header
LB: loop body
LE: loop exit
PB: predicated region body
PF: predicated region fallthrough
CT: control target
= control target key end

     0   :  { %8 = vsyncpa [#allocation3], 0  ;;  %s741_s0 = inlined_call_operand.hbm [shape: f32[2,8,12], index: 0, kind: input, shape index: {}, may-alias: {0,3}]   ;;  %s742_s1 = inlined_call_operand.vmem [shape: f32[8,1], index: 1, kind: input, shape index: {}]   ;;  %s743_s2 = inlined_call_operand.vmem [shape: f32[8,1], index: 2, kind: input, shape index: {}]   ;;  %s744_s3 = inlined_call_operand.hbm [shape: f32[2,8,12], index: 3, kind: output, shape index: {}, may-alias: {0,3}]  }
   0x1   :  { %10 = vsyncpa [#allocation3 + $0x1], 0 }
   0x2   :  { %11 = vsyncpa [#allocation4], 0 }
   0x3   :  { %13 = vsyncpa [#allocation4 + $0x1], 0  ;;  %s615_s12 = smov 0   ;;  %s617_s13 = smov 0  }
   0x4   :  { %s619_s14 = smov 0   ;;  %s621_s15 = smov 0  }
   0x5   :  { %s623_s16 = smov 0   ;;  %s625_s17 = smov 0  }
   0x6 LB: > { %s401_s18 = sadd.s32 4294967295, %s592_s17   ;;  %s402_s19 = sadd.s32 4294967294, %s592_s17   ;;  %s592_s17 = sphi %s625_s17, %s19_s17   ;;  %s588_s16 = sphi %s623_s16, %s753_s16   ;;  %s584_s15 = sphi %s621_s15, %s752_s15   ;;  %s580_s14 = sphi %s619_s14, %s751_s14   ;;  %s576_s13 = sphi %s617_s13, %s750_s13   ;;  %s572_s12 = sphi %s615_s12, %s749_s12  }
   0x7   : > { %s34_s20 = sadd.s32 1, %s588_s16  ;;  %s49_s21 = sadd.s32 1, %s580_s14 }
   0x8   : > { %p36_p0 = scmp.ge.s32.totalorder %s34_s20, 2  ;;  %p56_p1 = scmp.ne.s32.totalorder %s580_s14, %s576_s13 }
   0x9   : > { %p57_p2 = scmp.eq.s32.totalorder %s592_s17, 0  ;;  %p62_p3 = scmp.ne.s32.totalorder %s576_s13, %s572_s12 }
   0xa   : > { %s755_s20 = smov (%p36_p0, %s34_s20), 0  ;;  %p63_p5 = scmp.eq.s32.totalorder %s401_s18, 0 }
   0xb   : > { %p656_p4 = por %p57_p2, %p56_p1  ;;  %s42_s23 = ssub.s32 %s588_s16, %s755_s20 }
   0xc   : > { %p142_p6 = scmp.eq.s32.totalorder %s401_s18, 1  ;;  %p47_p7 = scmp.eq.s32.totalorder %s42_s23, 0 }
   0xd   : > { %p662_p8 = por %p63_p5, %p62_p3  ;;  %p148_p10 = scmp.eq.s32.totalorder %s402_s19, 1 }
   0xe   : > { %p666_p9 = por %p142_p6, %p56_p1  ;;  %p406_p12 = scmp.ge.s32.totalorder %s592_s17, 2 }
   0xf   : > { %s671_s26 = scalar_select %p47_p7, %s580_s14, %s49_s21  }
  0x10   : > { %p673_p11 = por %p148_p10, %p62_p3  ;;  %p428_p13 = scmp.lt.s32.totalorder %s592_s17, 2 }
  0x11   : > { %s182_s28 = sand.u32 1, %s580_s14   ;;  %s408_s30 = sshll.u32 %s588_s16, 3 }
  0x12   : > { %s407_s29 = sshll.u32 %s182_s28, 3  ;;  %s192_s6 = scalar_lea.hbm %s741_s0, %s408_s30 }
  0x13   : > { %s186_s7 = scalar_lea.vmem [#allocation2], %s407_s29  ;;  %s194_s9 = sshll.u32 %s192_s6, 4  ;;  %s195_s9 = int_to_ptr.hbm [resolvable:$true] %s194_s9 }
  0x14   : > { %s196_s8 = sshll.u32 %s186_s7, 4  ;;  %p421_p0 = pnand %p428_p13, %p656_p4  ;;  %s197_s8 = int_to_ptr.vmem [resolvable:$true] %s196_s8 }
  0x15   : > { %p409_p1 = scmp.ge.s32.totalorder %s592_s17, 1  ;;  %p201_p2 = scmp.lt.s32.totalorder %s592_s17, 3 }
  0x16   : > { %s183_s10 = scalar_lea.sflag [#allocation3], %s182_s28 }
  0x17   : > { %423 = dma.hbm_to_vmem [thread:$0]  (!%p421_p0), %s195_s9, 128, %s197_s8, %s183_s10  }
  0x18   : > { %p202_p3 = pnand %p409_p1, %p201_p2 }
  0x19   : > { %s689_s11 = sand.u32 (!%p202_p3), 1, %s576_s13  }
  0x1a   : > { %205 = sbr.rel (%p202_p3) target bundleno = 164 (0xa4), region = 32  ;;  %s410_s18 = sshll.u32 (!%p202_p3), %s689_s11, 3 }
  0x1b   : > { %s208_s19 = scalar_lea.sflag (!%p202_p3), [#allocation3], %s689_s11  ;;  %s211_s21 = scalar_lea.vmem (!%p202_p3), [#allocation2], %s410_s18 }
  0x1f   : > { %563 = dma.done.wait (%p662_p8), %s208_s19, 128  }
  0x20   : > { %565 = vsyncadd (%p662_p8), %s208_s19, 4294967168  ;;  %v594_v0 = vmov 0   ;;  %v252_v1 = vld [vmem:[%s742_s1] sm:$0xff]  ;;  %s413_s30 = sshll.u32 %s584_s15, 3  ;;  %s242_s6 = scalar_lea.vmem [#allocation5], %s410_s18 }
  0x21   : > { %479 = vset.pattern.permute.xlu0 %v594_v0  ;;  %v259_v2 = vld [vmem:[%s743_s2] sm:$0xff]  ;;  %s281_s5 = scalar_lea.hbm %s744_s3, %s413_s30  ;;  %s283_s7 = sshll.u32 %s242_s6, 4  ;;  %s284_s7 = int_to_ptr.vmem [resolvable:$true] %s283_s7 }
  0x22   : > { %255 = vperm.xlu0 %479, %v252_v1   ;;  %v251_v4 = vld [vmem:[%s211_s21] sm:$0xff]  ;;  %s285_s8 = sshll.u32 %s281_s5, 4  ;;  %s269_s9 = scalar_lea.sflag [#allocation4], %s689_s11  ;;  %s286_s8 = int_to_ptr.hbm [resolvable:$true] %s285_s8 }
  0x23   : > { %s524_s10 = sshra.s32 %s286_s8, 4  ;;  %s530_s22 = scalar_lea.hbm %s744_s3, 16  ;;  %s525_s10 = int_to_ptr.hbm [resolvable:$true] %s524_s10 }
  0x24   : > { %s526_s15 = scalar_lea.hbm %s525_s10, 8  ;;  %p531_p7 = scmp.lt.s32.totalorder %s525_s10, %s744_s3 }
  0x25   : > { %p527_p4 = scmp.ne.s32.totalorder %s525_s10, %s526_s15  ;;  %p532_p8 = scmp.lt.s32.totalorder %s530_s22, %s526_s15 }
  0x27   : > { %p528_p5 = pnand %p527_p4, %p666_p9  ;;  %p533_p10 = por %p532_p8, %p531_p7 }
  0x29   : > { %p529_p6 = pneg %p528_p5 }
  0x2a   : > { %262 = vperm.xlu0 %479, %v259_v2  }
  0x2b   : > { %p534_p13 = pnand %p533_p10, %p529_p6 }
  0x94   : > { %v256_v3 = vpop.permute.xlu0 %255 }
  0x95   : > { %v258_v5 = vmul.f32 %v256_v3, %v251_v4 }
  0x9c   : > { %v263_v6 = vpop.permute.xlu0 %262 }
  0x9d   : > { %v265_v7 = vadd.f32 %v263_v6, %v258_v5 }
  0x9f   : > { %v266_v8 = vmax.f32 %v265_v7, 0.0 }
  0xa1   : > { %267 = vst [vmem:[%s242_s6] sm:$0xff] %v266_v8 }
  0xa2   : > { %537 = shalt.err (!%p534_p13)
}
  0xa3   : > { %418 = dma.vmem_to_hbm [thread:$0]  (%p666_p9), %s284_s7, 128, %s286_s8, %s269_s9  }
  0xa4 PF: > { %s297_s11 = sand.u32 1, %s572_s12   ;;  %p425_p0 = pnand %p406_p12, %p673_p11 }
  0xa5   : > { %s298_s28 = scalar_lea.sflag [#allocation4], %s297_s11 }
  0xa6   : > { %p426_p1 = pneg %p425_p0 }
  0xa8   : > { %567 = dma.done.wait (%p426_p1), %s298_s28, 128  }
  0xa9   : > { %569 = vsyncadd (%p426_p1), %s298_s28, 4294967168  ;;  %s19_s17 = sadd.s32 1, %s592_s17   ;;  %s749_s12 = smov %s576_s13 }
  0xaa   : > { %p16_p2 = scmp.ge.s32.totalorder %s19_s17, 4   ;;  %s750_s13 = smov %s580_s14 }
  0xab   : > { %s751_s14 = smov %s671_s26  ;;  %s752_s15 = smov %s588_s16 }
  0xac   : > { %s753_s16 = smov %s755_s20  ;;  %18 = sbr.rel (!%p16_p2) target bundleno = 6 (0x6), region = 83 }
  0xb1   :  { %304 = vsyncpa [#allocation3], 1 }
  0xb2   :  { %306 = vsyncpa [#allocation3 + $0x1], 1 }
  0xb3   :  { %307 = vsyncpa [#allocation4], 1 }
  0xb4   :  { %309 = vsyncpa [#allocation4 + $0x1], 1 }

</bundles_post_ra>
